<compile_context>
chip_gen: v6e
topology: v6e:2x2x1
jax: 0.10.0
libtpu: 0.0.40
codegen_flags: <defaults>
</compile_context>

<pallas_src>
import functools

import jax
import jax.numpy as jnp
from jax.experimental import pallas as pl
from jax.experimental.pallas import tpu as pltpu


def _round_up(x, m):
    return (x + m - 1) // m * m


# ----------------------------------------------------------------------------
# Pallas kernels
# ----------------------------------------------------------------------------
def _wxp_kernel(w_ref, p_ref, b_ref, o_ref, *, activation):
    # out = act(W @ P + b) with lane dim = batch*spatial (lane-dense stores).
    acc = jnp.dot(w_ref[...], p_ref[...], preferred_element_type=jnp.float32)
    acc = acc + b_ref[...]                      # (O, 1) broadcasts over lanes
    if activation == "relu":
        acc = jnp.maximum(acc, 0.0)
    elif activation == "sigmoid":
        acc = jax.nn.sigmoid(acc)
    o_ref[...] = acc.astype(o_ref.dtype)


def matmul_lane(w, p, b, activation="none", tile_n=512):
    """act(w @ p + b[:, None]).  w:(O,K)  p:(K,N)  b:(O,) -> (O,N) float32.

    Grid over lane (N) tiles; weights/bias stay resident in VMEM across the
    grid; MXU operands are bf16 with f32 accumulation.
    """
    O, K = w.shape
    K2, N = p.shape
    assert K == K2, (w.shape, p.shape)
    TN = min(tile_n, _round_up(N, 128))
    Np = _round_up(N, TN)
    if Np != N:
        p = jnp.pad(p, ((0, 0), (0, Np - N)))
    out = pl.pallas_call(
        functools.partial(_wxp_kernel, activation=activation),
        out_shape=jax.ShapeDtypeStruct((O, Np), jnp.float32),
        grid=(Np // TN,),
        in_specs=[
            pl.BlockSpec((O, K), lambda j: (0, 0)),      # weights (resident)
            pl.BlockSpec((K, TN), lambda j: (0, j)),     # patch tile
            pl.BlockSpec((O, 1), lambda j: (0, 0)),      # bias (resident)
        ],
        out_specs=pl.BlockSpec((O, TN), lambda j: (0, j)),
        compiler_params=pltpu.CompilerParams(
            dimension_semantics=("parallel",)),
    )(w.astype(jnp.bfloat16), p.astype(jnp.bfloat16),
      b.reshape(O, 1).astype(jnp.float32))
    return out[:, :N] if Np != N else out


def _fc_stage_kernel(h_ref, wml_ref, bml_ref, eps_ref, wd_ref, bd_ref,
                     ml_ref, d_ref, *, latent_dims):
    L = latent_dims
    # fused fc_mu | fc_logvar matmul (shared K=2c*49 read, one MXU pass)
    ml = jnp.dot(h_ref[...], wml_ref[...],
                 preferred_element_type=jnp.float32) + bml_ref[...]
    mu = ml[:, :L]
    logvar = ml[:, L:]
    # reparameterization epilogue: latent = mu + eps * exp(0.5 * logvar)
    latent = mu + eps_ref[...] * jnp.exp(0.5 * logvar)
    # decoder fc chained in the same kernel (latent never leaves VMEM)
    d = jnp.dot(latent.astype(wd_ref.dtype), wd_ref[...],
                preferred_element_type=jnp.float32) + bd_ref[...]
    ml_ref[...] = ml
    d_ref[...] = d


def fc_stage(h, eps, wml, bml, wd, bd, latent_dims, tile_b=128):
    """[mu|logvar], decoded = fused fc stage.  h:(B,F) eps:(B,L)."""
    B, F = h.shape
    L = latent_dims
    Fd = wd.shape[1]
    TB = min(tile_b, B)
    Bp = _round_up(B, TB)
    if Bp != B:
        h = jnp.pad(h, ((0, Bp - B), (0, 0)))
        eps = jnp.pad(eps, ((0, Bp - B), (0, 0)))
    ml, d = pl.pallas_call(
        functools.partial(_fc_stage_kernel, latent_dims=L),
        out_shape=(jax.ShapeDtypeStruct((Bp, 2 * L), jnp.float32),
                   jax.ShapeDtypeStruct((Bp, Fd), jnp.float32)),
        grid=(Bp // TB,),
        in_specs=[
            pl.BlockSpec((TB, F), lambda i: (i, 0)),
            pl.BlockSpec((F, 2 * L), lambda i: (0, 0)),
            pl.BlockSpec((1, 2 * L), lambda i: (0, 0)),
            pl.BlockSpec((TB, L), lambda i: (i, 0)),
            pl.BlockSpec((L, Fd), lambda i: (0, 0)),
            pl.BlockSpec((1, Fd), lambda i: (0, 0)),
        ],
        out_specs=(pl.BlockSpec((TB, 2 * L), lambda i: (i, 0)),
                   pl.BlockSpec((TB, Fd), lambda i: (i, 0))),
        compiler_params=pltpu.CompilerParams(
            dimension_semantics=("parallel",)),
    )(h.astype(jnp.bfloat16), wml.astype(jnp.bfloat16),
      bml.reshape(1, 2 * L).astype(jnp.float32),
      eps.astype(jnp.float32),
      wd.astype(jnp.bfloat16), bd.reshape(1, Fd).astype(jnp.float32))
    if Bp != B:
        ml, d = ml[:B], d[:B]
    return ml, d


# ----------------------------------------------------------------------------
# Layout glue (XLA gathers between pallas_calls; no dense compute here)
# ----------------------------------------------------------------------------
def conv_patches(x):
    """Conv2d(k=4, s=2, p=1) im2col in (C*16, B*Ho*Wo) orientation."""
    B, C, H, W = x.shape
    Ho, Wo = H // 2, W // 2
    xp = jnp.pad(x, ((0, 0), (0, 0), (1, 1), (1, 1)))
    cols = []
    for kh in range(4):
        for kw in range(4):
            cols.append(xp[:, :, kh:kh + 2 * Ho:2, kw:kw + 2 * Wo:2])
    p = jnp.stack(cols, axis=0)                 # (16, B, C, Ho, Wo)
    p = p.transpose(2, 0, 1, 3, 4)              # (C, 16, B, Ho, Wo)
    return p.reshape(C * 16, B * Ho * Wo), Ho, Wo


def deconv_patches(x):
    """3x3 shifted-window (stride-1) patches in (C*9, B*H*W) orientation."""
    B, C, H, W = x.shape
    xp = jnp.pad(x, ((0, 0), (0, 0), (1, 1), (1, 1)))
    cols = []
    for dh in range(3):
        for dw in range(3):
            cols.append(xp[:, :, dh:dh + H, dw:dw + W])
    p = jnp.stack(cols, axis=0)                 # (9, B, C, H, W)
    p = p.transpose(2, 0, 1, 3, 4)              # (C, 9, B, H, W)
    return p.reshape(C * 9, B * H * W)


def deconv_subpixel_weight(w_t):
    """ConvTranspose2d(k=4, s=2, p=1) weight (Cin,Cout,4,4) -> sub-pixel
    weight (4*Cout, Cin*9): row = (r*2+t)*Cout + o, col = c*9 + (dh+1)*3 + (dw+1),
    so  out[b, o, 2m+r, 2n+t] = sum_{c,dh,dw} W[row, col] * x[b, c, m+dh, n+dw]."""
    Cin, Cout = w_t.shape[:2]
    K = jnp.zeros((2, 2, Cout, Cin, 3, 3), w_t.dtype)
    for r in range(2):
        for t in range(2):
            for dh in (-1, 0, 1):
                kh = r + 1 - 2 * dh
                if not 0 <= kh <= 3:
                    continue
                for dw in (-1, 0, 1):
                    kw = t + 1 - 2 * dw
                    if not 0 <= kw <= 3:
                        continue
                    K = K.at[r, t, :, :, dh + 1, dw + 1].set(w_t[:, :, kh, kw].T)
    return K.reshape(4 * Cout, Cin * 9)


def interleave_phases(o_ph, B, Cout, H, W):
    """(4*Cout, B*H*W) phase outputs -> (B, Cout, 2H, 2W)."""
    o = o_ph.reshape(2, 2, Cout, B, H, W)        # (r, t, o, b, m, n)
    o = o.transpose(3, 2, 4, 0, 5, 1)            # (b, o, m, r, n, t)
    return o.reshape(B, Cout, 2 * H, 2 * W)


# ----------------------------------------------------------------------------
# VAE forward pass
# ----------------------------------------------------------------------------
def init_params(key, capacity, latent_dims):
    c = capacity
    ks = jax.random.split(key, 7)
    scale = 0.05

    def nrm(k, shape):
        return scale * jax.random.normal(k, shape, dtype=jnp.float32)

    return {
        # encoder
        "e_conv1_w": nrm(ks[0], (c, 1, 4, 4)),
        "e_conv1_b": jnp.zeros((c,), jnp.float32),
        "e_conv2_w": nrm(ks[1], (2 * c, c, 4, 4)),
        "e_conv2_b": jnp.zeros((2 * c,), jnp.float32),
        "fc_mu_w": nrm(ks[2], (latent_dims, 2 * c * 7 * 7)),    # (out, in)
        "fc_mu_b": jnp.zeros((latent_dims,), jnp.float32),
        "fc_lv_w": nrm(ks[3], (latent_dims, 2 * c * 7 * 7)),
        "fc_lv_b": jnp.zeros((latent_dims,), jnp.float32),
        # decoder
        "d_fc_w": nrm(ks[4], (2 * c * 7 * 7, latent_dims)),     # (out, in)
        "d_fc_b": jnp.zeros((2 * c * 7 * 7,), jnp.float32),
        "d_conv2_w": nrm(ks[5], (2 * c, c, 4, 4)),              # ConvT: (Cin,Cout,k,k)
        "d_conv2_b": jnp.zeros((c,), jnp.float32),
        "d_conv1_w": nrm(ks[6], (c, 1, 4, 4)),
        "d_conv1_b": jnp.zeros((1,), jnp.float32),
    }


def vae_forward(params, x, eps, capacity, latent_dims):
    c = capacity
    L = latent_dims
    B = x.shape[0]

    # ---- Encoder ----
    p1, H1, W1 = conv_patches(x)                                       # (16, B*196)
    a1 = matmul_lane(params["e_conv1_w"].reshape(c, 16), p1,
                     params["e_conv1_b"], activation="relu")           # (c, B*196)
    a1_img = a1.reshape(c, B, H1, W1).transpose(1, 0, 2, 3)            # (B, c, 14, 14)

    p2, H2, W2 = conv_patches(a1_img)                                  # (c*16, B*49)
    a2 = matmul_lane(params["e_conv2_w"].reshape(2 * c, c * 16), p2,
                     params["e_conv2_b"], activation="relu")           # (2c, B*49)
    # PyTorch flatten order: feature = ch*49 + i*7 + j
    h = a2.reshape(2 * c, B, H2 * W2).transpose(1, 0, 2).reshape(B, 2 * c * H2 * W2)

    # ---- Fused fc_mu|fc_logvar + reparameterization + decoder fc ----
    wml = jnp.concatenate([params["fc_mu_w"].T, params["fc_lv_w"].T], axis=1)
    bml = jnp.concatenate([params["fc_mu_b"], params["fc_lv_b"]])
    ml, d = fc_stage(h, eps, wml, bml, params["d_fc_w"].T, params["d_fc_b"], L)
    mu, logvar = ml[:, :L], ml[:, L:]

    # ---- Decoder (sub-pixel transposed convs: no zero-dilation waste) ----
    d_img = d.reshape(B, 2 * c, 7, 7)
    pd2 = deconv_patches(d_img)                                        # (2c*9, B*49)
    o2 = matmul_lane(deconv_subpixel_weight(params["d_conv2_w"]), pd2,
                     jnp.tile(params["d_conv2_b"], 4), activation="relu")
    a_d2 = interleave_phases(o2, B, c, 7, 7)                           # (B, c, 14, 14)

    pd1 = deconv_patches(a_d2)                                         # (c*9, B*196)
    o1 = matmul_lane(deconv_subpixel_weight(params["d_conv1_w"]), pd1,
                     jnp.tile(params["d_conv1_b"], 4), activation="sigmoid")
    x_recon = interleave_phases(o1, B, 1, 14, 14)                      # (B, 1, 28, 28)
    return x_recon, mu, logvar


# ----------------------------------------------------------------------------
# Pure-JAX (f32) reference for a correctness spot-check
# ----------------------------------------------------------------------------
def _ref_forward(params, x, eps, capacity):
    c = capacity
    B = x.shape[0]
    dn = ("NCHW", "OIHW", "NCHW")

    def conv(x, w, b, stride, pad):
        y = jax.lax.conv_general_dilated(x, w, (stride, stride),
                                         [(pad, pad), (pad, pad)],
                                         dimension_numbers=dn)
        return y + b.reshape(1, -1, 1, 1)

    def deconv(x, w_t, b, stride, pad, k):
        w = jnp.flip(w_t, (2, 3)).transpose(1, 0, 2, 3)    # (Cout, Cin, k, k)
        y = jax.lax.conv_general_dilated(x, w, (1, 1),
                                         [(k - 1 - pad, k - 1 - pad)] * 2,
                                         lhs_dilation=(stride, stride),
                                         dimension_numbers=dn)
        return y + b.reshape(1, -1, 1, 1)

    h = jax.nn.relu(conv(x, params["e_conv1_w"], params["e_conv1_b"], 2, 1))
    h = jax.nn.relu(conv(h, params["e_conv2_w"], params["e_conv2_b"], 2, 1))
    hf = h.reshape(B, -1)
    mu = hf @ params["fc_mu_w"].T + params["fc_mu_b"]
    logvar = hf @ params["fc_lv_w"].T + params["fc_lv_b"]
    latent = mu + eps * jnp.exp(0.5 * logvar)
    d = latent @ params["d_fc_w"].T + params["d_fc_b"]
    d = d.reshape(B, 2 * c, 7, 7)
    d = jax.nn.relu(deconv(d, params["d_conv2_w"], params["d_conv2_b"], 2, 1, 4))
    xr = jax.nn.sigmoid(deconv(d, params["d_conv1_w"], params["d_conv1_b"], 2, 1, 4))
    return xr, mu, logvar


if __name__ == "__main__":
    # 28x28 single-channel input (two stride-2 convs -> 7x7, matching the
    # module's hard-coded 7*7 constants).
    batch = 2
    capacity = 8
    latent_dims = 16

    key = jax.random.PRNGKey(0)
    k_x, k_eps, k_params = jax.random.split(key, 3)

    x = jax.random.normal(k_x, (batch, 1, 28, 28), dtype=jnp.float32)
    eps = jax.random.normal(k_eps, (batch, latent_dims), dtype=jnp.float32)
    params = init_params(k_params, capacity, latent_dims)

    fwd = jax.jit(functools.partial(vae_forward, capacity=capacity,
                                    latent_dims=latent_dims))
    x_recon, mu, logvar = fwd(params, x, eps)
    jax.block_until_ready((x_recon, mu, logvar))

    assert x_recon.shape == (batch, 1, 28, 28)
    assert mu.shape == (batch, latent_dims)
    assert logvar.shape == (batch, latent_dims)
    assert bool(jnp.all(x_recon >= 0.0) & jnp.all(x_recon <= 1.0))

    # Loose tolerance: MXU operands are bf16 (f32 accumulation/epilogues).
    xr_ref, mu_ref, lv_ref = _ref_forward(params, x, eps, capacity)
    for got, ref in ((x_recon, xr_ref), (mu, mu_ref), (logvar, lv_ref)):
        assert float(jnp.max(jnp.abs(got - ref))) < 5e-2

    print("KERNEL_OK")
</pallas_src>

<mosaic_0001>
module attributes {stable_mosaic.version = 11 : i64} {
  func.func @_wxp_kernel(%arg0: i32, %arg1: memref<8x16xbf16, #tpu.memory_space<vmem>>, %arg2: memref<16x512xbf16, #tpu.memory_space<vmem>>, %arg3: memref<8x1xf32, #tpu.memory_space<vmem>>, %arg4: memref<8x512xf32, #tpu.memory_space<vmem>>) attributes {dimension_semantics = [#tpu.dimension_semantics<parallel>], iteration_bounds = array<i64: 1>, scalar_prefetch = 0 : i64, scratch_operands = 0 : i64, tpu.core_type = #tpu.core_type<tc>, window_params = [{pipeline_mode = #tpu.pipeline_mode<synchronous>, transform_indices = @transform_0, window_bounds = array<i64: 8, 16>}, {transform_indices = @transform_1, window_bounds = array<i64: 16, 512>}, {pipeline_mode = #tpu.pipeline_mode<synchronous>, transform_indices = @transform_2, window_bounds = array<i64: 8, 1>}, {transform_indices = @transform_3, window_bounds = array<i64: 8, 512>}]} {
    %c0 = arith.constant 0 : index
    %c0_0 = arith.constant 0 : index
    %0 = vector.load %arg1[%c0, %c0_0] : memref<8x16xbf16, #tpu.memory_space<vmem>>, vector<8x16xbf16>
    %c0_1 = arith.constant 0 : index
    %c0_2 = arith.constant 0 : index
    %1 = vector.load %arg2[%c0_1, %c0_2] : memref<16x512xbf16, #tpu.memory_space<vmem>>, vector<16x512xbf16>
    %cst = arith.constant dense<0.000000e+00> : vector<8x512xf32>
    %2 = tpu.matmul %0, %1, %cst {dimension_numbers = #tpu.dot_dimension_numbers<[1], [0], [0], [1], [0, 0, 1, 1], [], []>} : vector<8x16xbf16>, vector<16x512xbf16>, vector<8x512xf32> -> vector<8x512xf32>
    %c0_3 = arith.constant 0 : index
    %c0_4 = arith.constant 0 : index
    %3 = vector.load %arg3[%c0_3, %c0_4] : memref<8x1xf32, #tpu.memory_space<vmem>>, vector<8x1xf32>
    %4 = vector.broadcast %3 : vector<8x1xf32> to vector<8x512xf32>
    %5 = arith.addf %2, %4 : vector<8x512xf32>
    %cst_5 = arith.constant 0.000000e+00 : f32
    %6 = vector.broadcast %cst_5 : f32 to vector<8x512xf32>
    %7 = arith.maximumf %5, %6 : vector<8x512xf32>
    %c0_6 = arith.constant 0 : index
    %c0_7 = arith.constant 0 : index
    %8 = vector.load %arg4[%c0_6, %c0_7] : memref<8x512xf32, #tpu.memory_space<vmem>>, vector<8x512xf32>
    tpu.vector_store %arg4[%c0_6, %c0_7], %7 {strides = array<i32>} : memref<8x512xf32, #tpu.memory_space<vmem>>, vector<8x512xf32>,
    return
  }
  func.func @transform_0(%arg0: i32) -> (i32, i32) {
    %c0_i32 = arith.constant 0 : i32
    %c0_i32_0 = arith.constant 0 : i32
    %c0_i32_1 = arith.constant 0 : i32
    return %c0_i32, %c0_i32_0 : i32, i32
  }
  func.func @transform_1(%arg0: i32) -> (i32, i32) {
    %c0_i32 = arith.constant 0 : i32
    %c0_i32_0 = arith.constant 0 : i32
    return %c0_i32, %arg0 : i32, i32
  }
  func.func @transform_2(%arg0: i32) -> (i32, i32) {
    %c0_i32 = arith.constant 0 : i32
    %c0_i32_0 = arith.constant 0 : i32
    %c0_i32_1 = arith.constant 0 : i32
    return %c0_i32, %c0_i32_0 : i32, i32
  }
  func.func @transform_3(%arg0: i32) -> (i32, i32) {
    %c0_i32 = arith.constant 0 : i32
    %c0_i32_0 = arith.constant 0 : i32
    return %c0_i32, %arg0 : i32, i32
  }
}

module attributes {stable_mosaic.version = 11 : i64} {
  func.func @_wxp_kernel(%arg0: i32, %arg1: memref<16x128xbf16, #tpu.memory_space<vmem>>, %arg2: memref<128x128xbf16, #tpu.memory_space<vmem>>, %arg3: memref<16x1xf32, #tpu.memory_space<vmem>>, %arg4: memref<16x128xf32, #tpu.memory_space<vmem>>) attributes {dimension_semantics = [#tpu.dimension_semantics<parallel>], iteration_bounds = array<i64: 1>, scalar_prefetch = 0 : i64, scratch_operands = 0 : i64, tpu.core_type = #tpu.core_type<tc>, window_params = [{pipeline_mode = #tpu.pipeline_mode<synchronous>, transform_indices = @transform_0, window_bounds = array<i64: 16, 128>}, {transform_indices = @transform_1, window_bounds = array<i64: 128, 128>}, {pipeline_mode = #tpu.pipeline_mode<synchronous>, transform_indices = @transform_2, window_bounds = array<i64: 16, 1>}, {transform_indices = @transform_3, window_bounds = array<i64: 16, 128>}]} {
    %c0 = arith.constant 0 : index
    %c0_0 = arith.constant 0 : index
    %0 = vector.load %arg1[%c0, %c0_0] : memref<16x128xbf16, #tpu.memory_space<vmem>>, vector<16x128xbf16>
    %c0_1 = arith.constant 0 : index
    %c0_2 = arith.constant 0 : index
    %1 = vector.load %arg2[%c0_1, %c0_2] : memref<128x128xbf16, #tpu.memory_space<vmem>>, vector<128x128xbf16>
    %cst = arith.constant dense<0.000000e+00> : vector<16x128xf32>
    %2 = tpu.matmul %0, %1, %cst {dimension_numbers = #tpu.dot_dimension_numbers<[1], [0], [0], [1], [0, 0, 1, 1], [], []>} : vector<16x128xbf16>, vector<128x128xbf16>, vector<16x128xf32> -> vector<16x128xf32>
    %c0_3 = arith.constant 0 : index
    %c0_4 = arith.constant 0 : index
    %3 = vector.load %arg3[%c0_3, %c0_4] : memref<16x1xf32, #tpu.memory_space<vmem>>, vector<16x1xf32>
    %4 = vector.broadcast %3 : vector<16x1xf32> to vector<16x128xf32>
    %5 = arith.addf %2, %4 : vector<16x128xf32>
    %cst_5 = arith.constant 0.000000e+00 : f32
    %6 = vector.broadcast %cst_5 : f32 to vector<16x128xf32>
    %7 = arith.maximumf %5, %6 : vector<16x128xf32>
    %c0_6 = arith.constant 0 : index
    %c0_7 = arith.constant 0 : index
    %8 = vector.load %arg4[%c0_6, %c0_7] : memref<16x128xf32, #tpu.memory_space<vmem>>, vector<16x128xf32>
    tpu.vector_store %arg4[%c0_6, %c0_7], %7 {strides = array<i32>} : memref<16x128xf32, #tpu.memory_space<vmem>>, vector<16x128xf32>,
    return
  }
  func.func @transform_0(%arg0: i32) -> (i32, i32) {
    %c0_i32 = arith.constant 0 : i32
    %c0_i32_0 = arith.constant 0 : i32
    %c0_i32_1 = arith.constant 0 : i32
    return %c0_i32, %c0_i32_0 : i32, i32
  }
  func.func @transform_1(%arg0: i32) -> (i32, i32) {
    %c0_i32 = arith.constant 0 : i32
    %c0_i32_0 = arith.constant 0 : i32
    return %c0_i32, %arg0 : i32, i32
  }
  func.func @transform_2(%arg0: i32) -> (i32, i32) {
    %c0_i32 = arith.constant 0 : i32
    %c0_i32_0 = arith.constant 0 : i32
    %c0_i32_1 = arith.constant 0 : i32
    return %c0_i32, %c0_i32_0 : i32, i32
  }
  func.func @transform_3(%arg0: i32) -> (i32, i32) {
    %c0_i32 = arith.constant 0 : i32
    %c0_i32_0 = arith.constant 0 : i32
    return %c0_i32, %arg0 : i32, i32
  }
}

module attributes {stable_mosaic.version = 11 : i64} {
  func.func @_fc_stage_kernel(%arg0: i32, %arg1: memref<2x784xbf16, #tpu.memory_space<vmem>>, %arg2: memref<784x32xbf16, #tpu.memory_space<vmem>>, %arg3: memref<1x32xf32, #tpu.memory_space<vmem>>, %arg4: memref<2x16xf32, #tpu.memory_space<vmem>>, %arg5: memref<16x784xbf16, #tpu.memory_space<vmem>>, %arg6: memref<1x784xf32, #tpu.memory_space<vmem>>, %arg7: memref<2x32xf32, #tpu.memory_space<vmem>>, %arg8: memref<2x784xf32, #tpu.memory_space<vmem>>) attributes {dimension_semantics = [#tpu.dimension_semantics<parallel>], iteration_bounds = array<i64: 1>, scalar_prefetch = 0 : i64, scratch_operands = 0 : i64, tpu.core_type = #tpu.core_type<tc>, window_params = [{transform_indices = @transform_0, window_bounds = array<i64: 2, 784>}, {pipeline_mode = #tpu.pipeline_mode<synchronous>, transform_indices = @transform_1, window_bounds = array<i64: 784, 32>}, {pipeline_mode = #tpu.pipeline_mode<synchronous>, transform_indices = @transform_2, window_bounds = array<i64: 1, 32>}, {transform_indices = @transform_3, window_bounds = array<i64: 2, 16>}, {pipeline_mode = #tpu.pipeline_mode<synchronous>, transform_indices = @transform_4, window_bounds = array<i64: 16, 784>}, {pipeline_mode = #tpu.pipeline_mode<synchronous>, transform_indices = @transform_5, window_bounds = array<i64: 1, 784>}, {transform_indices = @transform_6, window_bounds = array<i64: 2, 32>}, {transform_indices = @transform_7, window_bounds = array<i64: 2, 784>}]} {
    %c0 = arith.constant 0 : index
    %c0_0 = arith.constant 0 : index
    %0 = vector.load %arg1[%c0, %c0_0] : memref<2x784xbf16, #tpu.memory_space<vmem>>, vector<2x784xbf16>
    %c0_1 = arith.constant 0 : index
    %c0_2 = arith.constant 0 : index
    %1 = vector.load %arg2[%c0_1, %c0_2] : memref<784x32xbf16, #tpu.memory_space<vmem>>, vector<784x32xbf16>
    %cst = arith.constant dense<0.000000e+00> : vector<2x32xf32>
    %2 = tpu.matmul %0, %1, %cst {dimension_numbers = #tpu.dot_dimension_numbers<[1], [0], [0], [1], [0, 0, 1, 1], [], []>} : vector<2x784xbf16>, vector<784x32xbf16>, vector<2x32xf32> -> vector<2x32xf32>
    %c0_3 = arith.constant 0 : index
    %c0_4 = arith.constant 0 : index
    %3 = vector.load %arg3[%c0_3, %c0_4] : memref<1x32xf32, #tpu.memory_space<vmem>>, vector<1x32xf32>
    %4 = vector.broadcast %3 : vector<1x32xf32> to vector<2x32xf32>
    %5 = arith.addf %2, %4 : vector<2x32xf32>
    %6 = vector.extract_strided_slice %5 {offsets = [0, 0], sizes = [2, 16], strides = [1, 1]} : vector<2x32xf32> to vector<2x16xf32>
    %7 = vector.extract_strided_slice %5 {offsets = [0, 16], sizes = [2, 16], strides = [1, 1]} : vector<2x32xf32> to vector<2x16xf32>
    %c0_5 = arith.constant 0 : index
    %c0_6 = arith.constant 0 : index
    %8 = vector.load %arg4[%c0_5, %c0_6] : memref<2x16xf32, #tpu.memory_space<vmem>>, vector<2x16xf32>
    %cst_7 = arith.constant 5.000000e-01 : f32
    %9 = vector.broadcast %cst_7 : f32 to vector<2x16xf32>
    %10 = arith.mulf %9, %7 : vector<2x16xf32>
    %11 = math.exp %10 : vector<2x16xf32>
    %12 = arith.mulf %8, %11 : vector<2x16xf32>
    %13 = arith.addf %6, %12 : vector<2x16xf32>
    %14 = arith.truncf %13 : vector<2x16xf32> to vector<2x16xbf16>
    %c0_8 = arith.constant 0 : index
    %c0_9 = arith.constant 0 : index
    %15 = vector.load %arg5[%c0_8, %c0_9] : memref<16x784xbf16, #tpu.memory_space<vmem>>, vector<16x784xbf16>
    %cst_10 = arith.constant dense<0.000000e+00> : vector<2x784xf32>
    %16 = tpu.matmul %14, %15, %cst_10 {dimension_numbers = #tpu.dot_dimension_numbers<[1], [0], [0], [1], [0, 0, 1, 1], [], []>} : vector<2x16xbf16>, vector<16x784xbf16>, vector<2x784xf32> -> vector<2x784xf32>
    %c0_11 = arith.constant 0 : index
    %c0_12 = arith.constant 0 : index
    %17 = vector.load %arg6[%c0_11, %c0_12] : memref<1x784xf32, #tpu.memory_space<vmem>>, vector<1x784xf32>
    %18 = vector.broadcast %17 : vector<1x784xf32> to vector<2x784xf32>
    %19 = arith.addf %16, %18 : vector<2x784xf32>
    %c0_13 = arith.constant 0 : index
    %c0_14 = arith.constant 0 : index
    %20 = vector.load %arg7[%c0_13, %c0_14] : memref<2x32xf32, #tpu.memory_space<vmem>>, vector<2x32xf32>
    tpu.vector_store %arg7[%c0_13, %c0_14], %5 {strides = array<i32>} : memref<2x32xf32, #tpu.memory_space<vmem>>, vector<2x32xf32>,
    %c0_15 = arith.constant 0 : index
    %c0_16 = arith.constant 0 : index
    %21 = vector.load %arg8[%c0_15, %c0_16] : memref<2x784xf32, #tpu.memory_space<vmem>>, vector<2x784xf32>
    tpu.vector_store %arg8[%c0_15, %c0_16], %19 {strides = array<i32>} : memref<2x784xf32, #tpu.memory_space<vmem>>, vector<2x784xf32>,
    return
  }
  func.func @transform_0(%arg0: i32) -> (i32, i32) {
    %c0_i32 = arith.constant 0 : i32
    %c0_i32_0 = arith.constant 0 : i32
    return %arg0, %c0_i32 : i32, i32
  }
  func.func @transform_1(%arg0: i32) -> (i32, i32) {
    %c0_i32 = arith.constant 0 : i32
    %c0_i32_0 = arith.constant 0 : i32
    %c0_i32_1 = arith.constant 0 : i32
    return %c0_i32, %c0_i32_0 : i32, i32
  }
  func.func @transform_2(%arg0: i32) -> (i32, i32) {
    %c0_i32 = arith.constant 0 : i32
    %c0_i32_0 = arith.constant 0 : i32
    %c0_i32_1 = arith.constant 0 : i32
    return %c0_i32, %c0_i32_0 : i32, i32
  }
  func.func @transform_3(%arg0: i32) -> (i32, i32) {
    %c0_i32 = arith.constant 0 : i32
    %c0_i32_0 = arith.constant 0 : i32
    return %arg0, %c0_i32 : i32, i32
  }
  func.func @transform_4(%arg0: i32) -> (i32, i32) {
    %c0_i32 = arith.constant 0 : i32
    %c0_i32_0 = arith.constant 0 : i32
    %c0_i32_1 = arith.constant 0 : i32
    return %c0_i32, %c0_i32_0 : i32, i32
  }
  func.func @transform_5(%arg0: i32) -> (i32, i32) {
    %c0_i32 = arith.constant 0 : i32
    %c0_i32_0 = arith.constant 0 : i32
    %c0_i32_1 = arith.constant 0 : i32
    return %c0_i32, %c0_i32_0 : i32, i32
  }
  func.func @transform_6(%arg0: i32) -> (i32, i32) {
    %c0_i32 = arith.constant 0 : i32
    %c0_i32_0 = arith.constant 0 : i32
    return %arg0, %c0_i32 : i32, i32
  }
  func.func @transform_7(%arg0: i32) -> (i32, i32) {
    %c0_i32 = arith.constant 0 : i32
    %c0_i32_0 = arith.constant 0 : i32
    return %arg0, %c0_i32 : i32, i32
  }
}

module attributes {stable_mosaic.version = 11 : i64} {
  func.func @_wxp_kernel(%arg0: i32, %arg1: memref<32x144xbf16, #tpu.memory_space<vmem>>, %arg2: memref<144x128xbf16, #tpu.memory_space<vmem>>, %arg3: memref<32x1xf32, #tpu.memory_space<vmem>>, %arg4: memref<32x128xf32, #tpu.memory_space<vmem>>) attributes {dimension_semantics = [#tpu.dimension_semantics<parallel>], iteration_bounds = array<i64: 1>, scalar_prefetch = 0 : i64, scratch_operands = 0 : i64, tpu.core_type = #tpu.core_type<tc>, window_params = [{pipeline_mode = #tpu.pipeline_mode<synchronous>, transform_indices = @transform_0, window_bounds = array<i64: 32, 144>}, {transform_indices = @transform_1, window_bounds = array<i64: 144, 128>}, {pipeline_mode = #tpu.pipeline_mode<synchronous>, transform_indices = @transform_2, window_bounds = array<i64: 32, 1>}, {transform_indices = @transform_3, window_bounds = array<i64: 32, 128>}]} {
    %c0 = arith.constant 0 : index
    %c0_0 = arith.constant 0 : index
    %0 = vector.load %arg1[%c0, %c0_0] : memref<32x144xbf16, #tpu.memory_space<vmem>>, vector<32x144xbf16>
    %c0_1 = arith.constant 0 : index
    %c0_2 = arith.constant 0 : index
    %1 = vector.load %arg2[%c0_1, %c0_2] : memref<144x128xbf16, #tpu.memory_space<vmem>>, vector<144x128xbf16>
    %cst = arith.constant dense<0.000000e+00> : vector<32x128xf32>
    %2 = tpu.matmul %0, %1, %cst {dimension_numbers = #tpu.dot_dimension_numbers<[1], [0], [0], [1], [0, 0, 1, 1], [], []>} : vector<32x144xbf16>, vector<144x128xbf16>, vector<32x128xf32> -> vector<32x128xf32>
    %c0_3 = arith.constant 0 : index
    %c0_4 = arith.constant 0 : index
    %3 = vector.load %arg3[%c0_3, %c0_4] : memref<32x1xf32, #tpu.memory_space<vmem>>, vector<32x1xf32>
    %4 = vector.broadcast %3 : vector<32x1xf32> to vector<32x128xf32>
    %5 = arith.addf %2, %4 : vector<32x128xf32>
    %cst_5 = arith.constant 0.000000e+00 : f32
    %6 = vector.broadcast %cst_5 : f32 to vector<32x128xf32>
    %7 = arith.maximumf %5, %6 : vector<32x128xf32>
    %c0_6 = arith.constant 0 : index
    %c0_7 = arith.constant 0 : index
    %8 = vector.load %arg4[%c0_6, %c0_7] : memref<32x128xf32, #tpu.memory_space<vmem>>, vector<32x128xf32>
    tpu.vector_store %arg4[%c0_6, %c0_7], %7 {strides = array<i32>} : memref<32x128xf32, #tpu.memory_space<vmem>>, vector<32x128xf32>,
    return
  }
  func.func @transform_0(%arg0: i32) -> (i32, i32) {
    %c0_i32 = arith.constant 0 : i32
    %c0_i32_0 = arith.constant 0 : i32
    %c0_i32_1 = arith.constant 0 : i32
    return %c0_i32, %c0_i32_0 : i32, i32
  }
  func.func @transform_1(%arg0: i32) -> (i32, i32) {
    %c0_i32 = arith.constant 0 : i32
    %c0_i32_0 = arith.constant 0 : i32
    return %c0_i32, %arg0 : i32, i32
  }
  func.func @transform_2(%arg0: i32) -> (i32, i32) {
    %c0_i32 = arith.constant 0 : i32
    %c0_i32_0 = arith.constant 0 : i32
    %c0_i32_1 = arith.constant 0 : i32
    return %c0_i32, %c0_i32_0 : i32, i32
  }
  func.func @transform_3(%arg0: i32) -> (i32, i32) {
    %c0_i32 = arith.constant 0 : i32
    %c0_i32_0 = arith.constant 0 : i32
    return %c0_i32, %arg0 : i32, i32
  }
}

module attributes {stable_mosaic.version = 11 : i64} {
  func.func @_wxp_kernel(%arg0: i32, %arg1: memref<4x72xbf16, #tpu.memory_space<vmem>>, %arg2: memref<72x512xbf16, #tpu.memory_space<vmem>>, %arg3: memref<4x1xf32, #tpu.memory_space<vmem>>, %arg4: memref<4x512xf32, #tpu.memory_space<vmem>>) attributes {dimension_semantics = [#tpu.dimension_semantics<parallel>], iteration_bounds = array<i64: 1>, scalar_prefetch = 0 : i64, scratch_operands = 0 : i64, tpu.core_type = #tpu.core_type<tc>, window_params = [{pipeline_mode = #tpu.pipeline_mode<synchronous>, transform_indices = @transform_0, window_bounds = array<i64: 4, 72>}, {transform_indices = @transform_1, window_bounds = array<i64: 72, 512>}, {pipeline_mode = #tpu.pipeline_mode<synchronous>, transform_indices = @transform_2, window_bounds = array<i64: 4, 1>}, {transform_indices = @transform_3, window_bounds = array<i64: 4, 512>}]} {
    %c0 = arith.constant 0 : index
    %c0_0 = arith.constant 0 : index
    %0 = vector.load %arg1[%c0, %c0_0] : memref<4x72xbf16, #tpu.memory_space<vmem>>, vector<4x72xbf16>
    %c0_1 = arith.constant 0 : index
    %c0_2 = arith.constant 0 : index
    %1 = vector.load %arg2[%c0_1, %c0_2] : memref<72x512xbf16, #tpu.memory_space<vmem>>, vector<72x512xbf16>
    %cst = arith.constant dense<0.000000e+00> : vector<4x512xf32>
    %2 = tpu.matmul %0, %1, %cst {dimension_numbers = #tpu.dot_dimension_numbers<[1], [0], [0], [1], [0, 0, 1, 1], [], []>} : vector<4x72xbf16>, vector<72x512xbf16>, vector<4x512xf32> -> vector<4x512xf32>
    %c0_3 = arith.constant 0 : index
    %c0_4 = arith.constant 0 : index
    %3 = vector.load %arg3[%c0_3, %c0_4] : memref<4x1xf32, #tpu.memory_space<vmem>>, vector<4x1xf32>
    %4 = vector.broadcast %3 : vector<4x1xf32> to vector<4x512xf32>
    %5 = arith.addf %2, %4 : vector<4x512xf32>
    %6 = arith.negf %5 : vector<4x512xf32>
    %7 = math.exp %6 : vector<4x512xf32>
    %cst_5 = arith.constant 1.000000e+00 : f32
    %8 = vector.broadcast %cst_5 : f32 to vector<4x512xf32>
    %9 = arith.addf %8, %7 : vector<4x512xf32>
    %10 = arith.divf %8, %9 : vector<4x512xf32>
    %c0_6 = arith.constant 0 : index
    %c0_7 = arith.constant 0 : index
    %11 = vector.load %arg4[%c0_6, %c0_7] : memref<4x512xf32, #tpu.memory_space<vmem>>, vector<4x512xf32>
    tpu.vector_store %arg4[%c0_6, %c0_7], %10 {strides = array<i32>} : memref<4x512xf32, #tpu.memory_space<vmem>>, vector<4x512xf32>,
    return
  }
  func.func @transform_0(%arg0: i32) -> (i32, i32) {
    %c0_i32 = arith.constant 0 : i32
    %c0_i32_0 = arith.constant 0 : i32
    %c0_i32_1 = arith.constant 0 : i32
    return %c0_i32, %c0_i32_0 : i32, i32
  }
  func.func @transform_1(%arg0: i32) -> (i32, i32) {
    %c0_i32 = arith.constant 0 : i32
    %c0_i32_0 = arith.constant 0 : i32
    return %c0_i32, %arg0 : i32, i32
  }
  func.func @transform_2(%arg0: i32) -> (i32, i32) {
    %c0_i32 = arith.constant 0 : i32
    %c0_i32_0 = arith.constant 0 : i32
    %c0_i32_1 = arith.constant 0 : i32
    return %c0_i32, %c0_i32_0 : i32, i32
  }
  func.func @transform_3(%arg0: i32) -> (i32, i32) {
    %c0_i32 = arith.constant 0 : i32
    %c0_i32_0 = arith.constant 0 : i32
    return %c0_i32, %arg0 : i32, i32
  }
}

</mosaic_0001>

<bundles_post_ra>
// kernel: vae_forward.5
= control target key start
LH: loop header
LB: loop body
LE: loop exit
PB: predicated region body
PF: predicated region fallthrough
CT: control target
= control target key end

     0   :  { %v158_v1 = vmov 0   ;;  %vm46_vm0 = vcmask 130048   ;;  %s209_s1 = inlined_call_operand.vmem [shape: bf16[16,512], index: 1, kind: input, shape index: {}]   ;;  %s210_s2 = inlined_call_operand.vmem [shape: f32[8,1], index: 2, kind: input, shape index: {}]   ;;  %s211_s0 = inlined_call_operand.vmem [shape: bf16[8,16], index: 0, kind: input, shape index: {}]   ;;  %s212_s3 = inlined_call_operand.vmem [shape: f32[8,512], index: 3, kind: output, shape index: {}]  }
   0x1   :  { %v152_v0 = vld [vmem:[%s209_s1 + $0x4] ss:$16 sps:$4 sm:$0xff]   ;;  %82 = vmatprep.mubr.bf16.mxu0 %v158_v1  ;;  %123 = vmatprep.mubr.bf16.mxu1 %v158_v1  ;;  %v154_v2 = vld [vmem:[%s209_s1 + $0xc] ss:$16 sps:$4 sm:$0xff]   ;;  %v156_v3 = vld [vmem:[%s209_s1] ss:$16 sps:$4 sm:$0xff]  }
   0x2   :  { %151 = vset.pattern.permute.xlu0 %v158_v1  ;;  %64 = vmatprep.subr.bf16.mxu0 %v152_v0  ;;  %v157_v4 = vld [vmem:[%s209_s1 + $0x8] ss:$16 sps:$4 sm:$0xff]   ;;  %v20_v5 = vld [vmem:[%s210_s2] sm:$0xff] }
   0x3   :  { %105 = vmatprep.subr.bf16.mxu1 %v154_v2  ;;  %65 = vmatpush1.bf16.msra.mxu0 %v156_v3  ;;  %v15_v6 = vld [vmem:[%s211_s0] sm:$0xf] }
   0x4   :  { %106 = vmatpush1.bf16.msra.mxu1 %v157_v4  ;;  %23 = vperm.xlu0 %151, %v20_v5  }
   0x6   :  { %148 = vmatmul.mubr.msk.bf16.vlgmr.msra.gmra.mxu0 %vm46_vm0, %v15_v6 }
   0x7   :  { %149 = vmatmul.mubr.msk.bf16.vlgmr.msra.gmra.mxu1 %vm46_vm0, %v15_v6 }
  0x7f   :  { %v24_v7 = vpop.permute.xlu0 %23 }
  0xc6   :  { %v84_v8 = vpop.f32.mrf.mxu0 }
  0xc7   :  { %v125_v9 = vpop.f32.mrf.mxu1  ;;  %v85_v10 = vadd.f32 %v84_v8, %v24_v7 }
  0xc8   :  { %v126_v11 = vadd.f32 %v125_v9, %v24_v7  ;;  %v86_v12 = vpop.f32.mrf.mxu0 }
  0xc9   :  { %v127_v13 = vpop.f32.mrf.mxu1  ;;  %v132_v14 = vmax.f32 %v85_v10, 0.0  ;;  %v87_v16 = vadd.f32 %v86_v12, %v24_v7 }
  0xca   :  { %v134_v15 = vmax.f32 %v126_v11, 0.0  ;;  %v128_v17 = vadd.f32 %v127_v13, %v24_v7  ;;  %v88_v18 = vpop.f32.mrf.mxu0 }
  0xcb   :  { %v129_v19 = vpop.f32.mrf.mxu1  ;;  %136 = vst [vmem:[%s212_s3] sm:$0xff] %v132_v14  ;;  %v133_v20 = vmax.f32 %v87_v16, 0.0 }
  0xcc   :  { %138 = vst [vmem:[%s212_s3 + $0x10] sm:$0xff] %v134_v15  ;;  %v135_v21 = vmax.f32 %v128_v17, 0.0  ;;  %v89_v22 = vpop.f32.mrf.mxu0 }
  0xcd   :  { %v130_v23 = vpop.f32.mrf.mxu1  ;;  %137 = vst [vmem:[%s212_s3 + $0x8] sm:$0xff] %v133_v20 }
  0xce   :  { %139 = vst [vmem:[%s212_s3 + $0x18] sm:$0xff] %v135_v21 }

// kernel: vae_forward.6
= control target key start
LH: loop header
LB: loop body
LE: loop exit
PB: predicated region body
PF: predicated region fallthrough
CT: control target
= control target key end

     0   :  { %v199_v0 = vmov 0.0   ;;  %vm200_vm0 = vmmov 0   ;;  %v201_v2 = vmov 0   ;;  %s261_s1 = inlined_call_operand.vmem [shape: bf16[128,128], index: 1, kind: input, shape index: {}]   ;;  %s262_s2 = inlined_call_operand.vmem [shape: f32[16,1], index: 2, kind: input, shape index: {}]   ;;  %s263_s0 = inlined_call_operand.vmem [shape: bf16[16,128], index: 0, kind: input, shape index: {}]   ;;  %s264_s3 = inlined_call_operand.vmem [shape: f32[16,128], index: 3, kind: output, shape index: {}]  }
   0x1   :  { %166 = vmatprep.subr.bf16.mxu0 %v199_v0  ;;  %v190_v1 = vld [vmem:[%s261_s1 + $0x38] sm:$0xff]   ;;  %182 = vmatprep.mubr.msk.bf16.mxu0 %vm200_vm0, %v199_v0  ;;  %v191_v3 = vld [vmem:[%s261_s1 + $0x30] sm:$0xff]   ;;  %v192_v4 = vld [vmem:[%s261_s1 + $0x28] sm:$0xff]  }
   0x2   :  { %189 = vset.pattern.permute.xlu0 %v201_v2  ;;  %167 = vmatpush3.bf16.msra.mxu0 %v190_v1  ;;  %v33_v5 = vld [vmem:[%s262_s2] sm:$0xff]  ;;  %v34_v7 = vld [vmem:[%s262_s2 + $0x8] sm:$0xff]  ;;  %v194_v8 = vld [vmem:[%s261_s1 + $0x18] sm:$0xff]  }
   0x3   :  { %168 = vmatprep.subr.bf16.mxu0 %v199_v0  ;;  %v193_v6 = vld [vmem:[%s261_s1 + $0x20] sm:$0xff]   ;;  %37 = vperm.xlu0 %189, %v33_v5   ;;  %v195_v9 = vld [vmem:[%s261_s1 + $0x10] sm:$0xff]   ;;  %v196_v10 = vld [vmem:[%s261_s1 + $0x8] sm:$0xff]  }
   0x4   :  { %v197_v11 = vld [vmem:[%s261_s1] sm:$0xff]  }
   0x5   :  { %v198_v12 = vld [vmem:[%s263_s0] sm:$0xff]  }
   0x6   :  { %169 = vmatpush3.bf16.msra.mxu0 %v191_v3 }
   0x7   :  { %170 = vmatprep.subr.bf16.mxu0 %v199_v0  ;;  %42 = vperm.xlu0 %189, %v34_v7  }
   0xa   :  { %171 = vmatpush3.bf16.msra.mxu0 %v192_v4 }
   0xb   :  { %172 = vmatprep.subr.bf16.mxu0 %v199_v0 }
   0xe   :  { %173 = vmatpush3.bf16.msra.mxu0 %v193_v6 }
   0xf   :  { %174 = vmatprep.subr.bf16.mxu0 %v199_v0 }
  0x12   :  { %175 = vmatpush3.bf16.msra.mxu0 %v194_v8 }
  0x13   :  { %176 = vmatprep.subr.bf16.mxu0 %v199_v0 }
  0x16   :  { %177 = vmatpush3.bf16.msra.mxu0 %v195_v9 }
  0x17   :  { %178 = vmatprep.subr.bf16.mxu0 %v199_v0 }
  0x1a   :  { %179 = vmatpush3.bf16.msra.mxu0 %v196_v10 }
  0x1b   :  { %180 = vmatprep.subr.bf16.mxu0 %v199_v0 }
  0x1e   :  { %181 = vmatpush3.bf16.msra.mxu0 %v197_v11 }
  0x21   :  { %183 = vmatmul.mubr.bf16.vlgmr.msra.gmra.mxu0 %v198_v12 }
  0x7e   :  { %v38_v13 = vpop.permute.xlu0 %37 }
  0x82   :  { %v43_v18 = vpop.permute.xlu0 %42 }
  0xe1   :  { %v133_v14 = vpop.f32.mrf.mxu0 }
  0xe2   :  { %v134_v15 = vadd.f32 %v133_v14, %v38_v13 }
  0xe3   :  { %v184_v16 = vpop.f32.mrf.mxu0 }
  0xe4   :  { %v140_v17 = vmax.f32 %v134_v15, 0.0 }
  0xe5   :  { %v136_v19 = vpop.f32.mrf.mxu0 }
  0xe6   :  { %142 = vst [vmem:[%s264_s3] sm:$0xff] %v140_v17  ;;  %v137_v20 = vadd.f32 %v136_v19, %v43_v18 }
  0xe7   :  { %v185_v21 = vpop.f32.mrf.mxu0 }
  0xe8   :  { %v141_v22 = vmax.f32 %v137_v20, 0.0 }
  0xea   :  { %143 = vst [vmem:[%s264_s3 + $0x8] sm:$0xff] %v141_v22 }

// kernel: vae_forward.7
= control target key start
LH: loop header
LB: loop body
LE: loop exit
PB: predicated region body
PF: predicated region fallthrough
CT: control target
= control target key end

     0   :  { %v1174_v21 = vmov 1966171168   ;;  %v137_v23 = vlaneseq  ;;  %v1175_v45 = vmov 0.0   ;;  %vm1176_vm0 = vmmov 0   ;;  %s1178_s17 = smov 112   ;;  %s1427_s1 = inlined_call_operand.vmem [shape: bf16[784,32], index: 1, kind: input, shape index: {}]   ;;  %s1428_s0 = inlined_call_operand.vmem [shape: bf16[2,784], index: 0, kind: input, shape index: {}]   ;;  %s1429_s4 = inlined_call_operand.vmem [shape: bf16[16,784], index: 4, kind: input, shape index: {}]   ;;  %s1430_s2 = inlined_call_operand.vmem [shape: f32[1,32], index: 2, kind: input, shape index: {}]   ;;  %s1431_s6 = inlined_call_operand.vmem [shape: f32[2,32], index: 6, kind: output, shape index: {0}]   ;;  %s1432_s3 = inlined_call_operand.vmem [shape: f32[2,16], index: 3, kind: input, shape index: {}]   ;;  %s1433_s5 = inlined_call_operand.vmem [shape: f32[1,784], index: 5, kind: input, shape index: {}]   ;;  %s1434_s7 = inlined_call_operand.vmem [shape: f32[2,784], index: 7, kind: output, shape index: {1}]  }
   0x1   :  { %v1112_v0 = vld [vmem:[%s1427_s1 + $0x78] sm:$0xff]   ;;  %v1116_v4 = vld [vmem:[%s1427_s1 + $0x70] sm:$0xff]   ;;  %v1120_v8 = vld [vmem:[%s1427_s1 + $0x68] sm:$0xff]   ;;  %v135_v22 = vunpack.c.l.s4 %v1174_v21  ;;  %vm481_vm1 = vcmask 130048   ;;  %vm903_vm2 = vcmask 254976   ;;  %vm948_vm3 = vcmask 1041408  }
   0x2   :  { %v1113_v1 = vld [vmem:[%s1427_s1 + $0x38] sm:$0xff]   ;;  %1024 = vmatprep.subr.bf16.mxu0 %v1112_v0  ;;  %v1117_v5 = vld [vmem:[%s1427_s1 + $0x30] sm:$0xff]   ;;  %v1121_v9 = vld [vmem:[%s1427_s1 + $0x28] sm:$0xff]   ;;  %v1295_v29 = vshrl.u32 %v137_v23, 7  ;;  %vm949_vm4 = vcmask 1043458   ;;  %vm951_vm6 = vcmask 128004  }
   0x3   :  { %v1114_v2 = vld [vmem:[%s1427_s1 + $0xf8] sm:$0xff]   ;;  %1025 = vmatpush3.bf16.msra.mxu0 %v1113_v1  ;;  %v1118_v6 = vld [vmem:[%s1427_s1 + $0xf0] sm:$0xff]   ;;  %v1122_v10 = vld [vmem:[%s1427_s1 + $0xe8] sm:$0xff]   ;;  %v136_v28 = vunpack.c.0.s8 %v135_v22 }
   0x4   :  { %v1115_v3 = vld [vmem:[%s1427_s1 + $0xb8] sm:$0xff]   ;;  %1046 = vmatprep.subr.bf16.mxu1 %v1114_v2  ;;  %1026 = vmatprep.subr.bf16.mxu0 %v1116_v4  ;;  %v1119_v7 = vld [vmem:[%s1427_s1 + $0xb0] sm:$0xff]   ;;  %v1123_v11 = vld [vmem:[%s1427_s1 + $0xa8] sm:$0xff]  }
   0x5   :  { %1047 = vmatpush3.bf16.msra.mxu1 %v1115_v3  ;;  %v1124_v12 = vld [vmem:[%s1427_s1 + $0x60] sm:$0xff]   ;;  %v1128_v16 = vld [vmem:[%s1427_s1 + $0x58] sm:$0xff]   ;;  %v1132_v20 = vld [vmem:[%s1427_s1 + $0x50] sm:$0xff]   ;;  %v139_v34 = vsub.s32 %v136_v28, %v1295_v29 }
   0x6   :  { %1048 = vmatprep.subr.bf16.mxu1 %v1118_v6  ;;  %v1125_v13 = vld [vmem:[%s1427_s1 + $0x20] sm:$0xff]   ;;  %v1129_v17 = vld [vmem:[%s1427_s1 + $0x18] sm:$0xff]   ;;  %v1133_v24 = vld [vmem:[%s1427_s1 + $0x10] sm:$0xff]  }
   0x7   :  { %1027 = vmatpush3.bf16.msra.mxu0 %v1117_v5  ;;  %v1126_v14 = vld [vmem:[%s1427_s1 + $0xe0] sm:$0xff]   ;;  %v1130_v18 = vld [vmem:[%s1427_s1 + $0xd8] sm:$0xff]   ;;  %v1134_v25 = vld [vmem:[%s1427_s1 + $0xd0] sm:$0xff]  }
   0x8   :  { %1028 = vmatprep.subr.bf16.mxu0 %v1120_v8  ;;  %v1127_v15 = vld [vmem:[%s1427_s1 + $0xa0] sm:$0xff]   ;;  %v1131_v19 = vld [vmem:[%s1427_s1 + $0x98] sm:$0xff]   ;;  %v1135_v26 = vld [vmem:[%s1427_s1 + $0x90] sm:$0xff]  }
   0x9   :  { %1049 = vmatpush3.bf16.msra.mxu1 %v1119_v7  ;;  %v1136_v27 = vld [vmem:[%s1427_s1 + $0x48] sm:$0xff]   ;;  %v1140_v33 = vld [vmem:[%s1427_s1 + $0x40] sm:$0xff]   ;;  %v1145_v41 = vld [vmem:[%s1427_s1 + $0x178] sm:$0xff]  }
   0xa   :  { %1050 = vmatprep.subr.bf16.mxu1 %v1122_v10  ;;  %v1137_v30 = vld [vmem:[%s1427_s1 + $0x8] sm:$0xff]   ;;  %v1141_v35 = vld [vmem:[%s1427_s1] sm:$0xff]   ;;  %v1146_v47 = vld [vmem:[%s1427_s1 + $0x138] sm:$0xff]  }
   0xb   :  { %1029 = vmatpush3.bf16.msra.mxu0 %v1121_v9  ;;  %v1138_v31 = vld [vmem:[%s1427_s1 + $0xc8] sm:$0xff]   ;;  %v1142_v36 = vld [vmem:[%s1427_s1 + $0xc0] sm:$0xff]   ;;  %v1147_v50 = vld [vmem:[%s1427_s1 + $0x170] sm:$0xff]  }
   0xc   :  { %1030 = vmatprep.subr.bf16.mxu0 %v1124_v12  ;;  %v1139_v32 = vld [vmem:[%s1427_s1 + $0x88] sm:$0xff]   ;;  %v26_v37 = vld [vmem:[%s1428_s0] sm:$0x7f]  ;;  %v1148_v53 = vld [vmem:[%s1427_s1 + $0x130] sm:$0xff]  }
   0xd   :  { %1051 = vmatpush3.bf16.msra.mxu1 %v1123_v11  ;;  %v133_v38 = vcombine.high %v26_v37, %v26_v37  ;;  %v140_v39 = vrot.slane %v26_v37, %v139_v34  ;;  %v1144_v40 = vld [vmem:[%s1427_s1 + $0x80] sm:$0xff]   ;;  %v1149_v54 = vld [vmem:[%s1427_s1 + $0x168] sm:$0xff]   ;;  %v1153_v59 = vld [vmem:[%s1427_s1 + $0x158] sm:$0xff]  }
   0xe   :  { %1052 = vmatprep.subr.bf16.mxu1 %v1126_v14  ;;  %v1150_v55 = vld [vmem:[%s1427_s1 + $0x128] sm:$0xff]   ;;  %v1151_v56 = vld [vmem:[%s1427_s1 + $0x160] sm:$0xff]   ;;  %v1154_v62 = vld [vmem:[%s1427_s1 + $0x118] sm:$0xff]  }
   0xf   :  { %1031 = vmatpush3.bf16.msra.mxu0 %v1125_v13  ;;  %v148_v42 = vcombine.high %v140_v39, %v140_v39  ;;  %v156_v43 = vrot.slane %v140_v39, %v139_v34  ;;  %v147_v44 = vrot.slane %v133_v38, %v139_v34  ;;  %v1152_v58 = vld [vmem:[%s1427_s1 + $0x120] sm:$0xff]   ;;  %v1155_v63 = vld [vmem:[%s1427_s1 + $0x150] sm:$0xff]   ;;  %v1157_v1 = vld [vmem:[%s1427_s1 + $0x148] sm:$0xff]  }
  0x10   :  { %1032 = vmatprep.subr.bf16.mxu0 %v1128_v16  ;;  %v1161_v60 = vld [vmem:[%s1427_s1 + $0x180] sm:$0xff]   ;;  %v1156_v0 = vld [vmem:[%s1427_s1 + $0x110] sm:$0xff]   ;;  %v1158_v2 = vld [vmem:[%s1427_s1 + $0x108] sm:$0xff]  }
  0x11   :  { %1053 = vmatpush3.bf16.msra.mxu1 %v1127_v15  ;;  %v170_v46 = vrot.slane %v148_v42, %v139_v34  ;;  %v149_v48 = vcombine.high %v147_v44, %v147_v44  ;;  %v178_v49 = vcombine.high %v156_v43, %v156_v43  ;;  %v163_v57 = vrot.slane %v147_v44, %v139_v34  ;;  %v1159_v3 = vld [vmem:[%s1427_s1 + $0x140] sm:$0xff]   ;;  %v1171_v44 = vld [vmem:[%s1429_s4 + $0x14] ss:$28 sps:$4 sm:$0xff]   ;;  %vm950_vm5 = vmor %vm949_vm4, %vm948_vm3 }
  0x12   :  { %1054 = vmatprep.subr.bf16.mxu1 %v1130_v18  ;;  %v1160_v4 = vld [vmem:[%s1427_s1 + $0x100] sm:$0xff]   ;;  %vm952_vm7 = vmor %vm951_vm6, %vm950_vm5 }
  0x13   :  { %1033 = vmatpush3.bf16.msra.mxu0 %v1129_v17  ;;  %517 = vmatprep.mubr.bf16.mxu0 %v170_v46  ;;  %v180_v51 = vcombine.high %v170_v46, %v170_v46  ;;  %v177_v52 = vrot.slane %v149_v48, %v139_v34  ;;  %v179_v61 = vcombine.high %v163_v57, %v163_v57  ;;  %v1162_v5 = vld [vmem:[%s1429_s4] ss:$28 sps:$4 sm:$0xff]   ;;  %v1165_v34 = vld [vmem:[%s1429_s4 + $0x18] ss:$28 sps:$4 sm:$0xff]   ;;  %v1166_v42 = vld [vmem:[%s1429_s4 + $0x8] ss:$28 sps:$4 sm:$0xff]  }
  0x14   :  { %1034 = vmatprep.subr.bf16.mxu0 %v1132_v20  ;;  %v1164_v6 = vld [vmem:[%s1429_s4 + $0x4] ss:$28 sps:$4 sm:$0xff]   ;;  %v672_v46 = vsub.s32 1, %v1295_v29 }
  0x15   :  { %1055 = vmatpush3.bf16.msra.mxu1 %v1131_v19  ;;  %557 = vmatprep.mubr.bf16.mxu1 %v180_v51  ;;  %v962_v20 = vld [vmem:[%s1430_s2] ss:$0 sm:$0xff] }
  0x16   :  { %1056 = vmatprep.subr.bf16.mxu1 %v1134_v25  ;;  %v645_v38 = vld [vmem:[%s1432_s3] sm:$0x3] }
  0x17   :  { %1035 = vmatpush3.bf16.msra.mxu0 %v1133_v24 }
  0x18   :  { %1036 = vmatprep.subr.bf16.mxu0 %v1136_v27 }
  0x19   :  { %1057 = vmatpush3.bf16.msra.mxu1 %v1135_v26 }
  0x1a   :  { %1058 = vmatprep.subr.bf16.mxu1 %v1138_v31 }
  0x1b   :  { %1037 = vmatpush3.bf16.msra.mxu0 %v1137_v30 }
  0x1c   :  { %1038 = vmatprep.subr.bf16.mxu0 %v1140_v33 }
  0x1d   :  { %1059 = vmatpush3.bf16.msra.mxu1 %v1139_v32 }
  0x1e   :  { %1060 = vmatprep.subr.bf16.mxu1 %v1142_v36  ;;  %v1177_v36 = vmov 0  }
  0x1f   :  { %1039 = vmatpush3.bf16.msra.mxu0 %v1141_v35  ;;  %v1168_v35 = vld [vmem:[%s1429_s4 + $0xc] ss:$28 sps:$4 sm:$0xff]  }
  0x20   :  { %1068 = vmatprep.subr.bf16.mxu0 %v1145_v41 }
  0x21   :  { %1061 = vmatpush3.bf16.msra.mxu1 %v1144_v40 }
  0x22   :  { %1094 = vmatprep.subr.bf16.mxu1 %v1175_v45  ;;  %518 = vmatmul.mubr.bf16.vlgmr.msra.gmra.mxu0 %v156_v43 }
  0x23   :  { %1069 = vmatpush3.bf16.msra.mxu0 %v1146_v47  ;;  %597 = vmatprep.mubr.bf16.mxu0 %v177_v52 }
  0x24   :  { %558 = vmatmul.mubr.bf16.vlgmr.msra.gmra.mxu1 %v178_v49  ;;  %1070 = vmatprep.subr.bf16.mxu0 %v1147_v50  ;;  %v668_v49 = vsub.s32 0, %v1295_v29  ;;  %v664_v50 = vld [vmem:[%s1433_s5] sm:$0x7f] }
  0x25   :  { %1096 = vmatprep.mubr.msk.bf16.mxu1 %vm1176_vm0, %v1175_v45  ;;  %1095 = vmatpush3.bf16.msra.mxu1 %v1161_v60 }
  0x26   :  { %754 = vmatprep.subr.bf16.mxu1 %v1164_v6 }
  0x27   :  { %1071 = vmatpush3.bf16.msra.mxu0 %v1148_v53  ;;  %v673_v53 = vrot.slane %v664_v50, %v672_v46 }
  0x28   :  { %1072 = vmatprep.subr.bf16.mxu0 %v1149_v54  ;;  %v676_v54 = vsub.s32 2, %v1295_v29 }
  0x2b   :  { %1073 = vmatpush3.bf16.msra.mxu0 %v1150_v55  ;;  %v680_v55 = vsub.s32 3, %v1295_v29 }
  0x2c   :  { %1074 = vmatprep.subr.bf16.mxu0 %v1151_v56  ;;  %1097 = vmatmul.mubr.msk.bf16.vlgmr.msra.gmra.mxu1 %vm481_vm1, %v179_v61 }
  0x2d   :  { %755 = vmatpush1.bf16.msra.mxu1 %v1162_v5  ;;  %772 = vmatprep.mubr.bf16.mxu1 %v1177_v36  ;;  %v692_v5 = vsub.s32 6, %v1295_v29 }
  0x2e   :  { %795 = vmatprep.subr.bf16.mxu1 %v1168_v35 }
  0x2f   :  { %1075 = vmatpush3.bf16.msra.mxu0 %v1152_v58  ;;  %v669_v58 = vrot.slane %v664_v50, %v668_v49 }
  0x30   :  { %1076 = vmatprep.subr.bf16.mxu0 %v1153_v59  ;;  %v1179_v59 = vmov 1983009808  }
  0x31   :  { %v915_v60 = vunpack.c.l.s4 %v1179_v59 }
  0x33   :  { %1077 = vmatpush3.bf16.msra.mxu0 %v1154_v62 }
  0x34   :  { %1078 = vmatprep.subr.bf16.mxu0 %v1155_v63 }
  0x37   :  { %1079 = vmatpush3.bf16.msra.mxu0 %v1156_v0  ;;  %v677_v0 = vrot.slane %v664_v50, %v676_v54 }
  0x38   :  { %1080 = vmatprep.subr.bf16.mxu0 %v1157_v1  ;;  %v681_v1 = vrot.slane %v664_v50, %v680_v55 }
  0x3b   :  { %1081 = vmatpush3.bf16.msra.mxu0 %v1158_v2 }
  0x3c   :  { %1082 = vmatprep.subr.bf16.mxu0 %v1159_v3 }
  0x3f   :  { %1083 = vmatpush3.bf16.msra.mxu0 %v1160_v4  ;;  %v916_v4 = vunpack.c.0.s8 %v915_v60 }
  0x40   :  { %1100 = vmatprep.subr.bf16.mxu0 %v1175_v45 }
  0x42   :  { %598 = vmatmul.mubr.bf16.vlgmr.msra.gmra.mxu0 %v163_v57 }
  0x43   :  { %1102 = vmatprep.mubr.msk.bf16.mxu0 %vm1176_vm0, %v1175_v45  ;;  %1101 = vmatpush3.bf16.msra.mxu0 %v1165_v34  ;;  %v1169_v45 = vld [vmem:[%s1429_s4 + $0x10] ss:$28 sps:$4 sm:$0xff]  }
  0xe2   :  { %v1040_v7 = vpop.f32.mrf.mxu0 }
  0xe4   :  { %v1041_v8 = vpop.f32.mrf.mxu0  ;;  %v1062_v9 = vpop.f32.mrf.mxu1 }
  0xe5   :  { %v1042_v19 = vadd.f32 %v1041_v8, %v1040_v7  ;;  %v684_v7 = vsub.s32 4, %v1295_v29 }
  0xe6   :  { %v1043_v10 = vpop.f32.mrf.mxu0  ;;  %v1063_v11 = vpop.f32.mrf.mxu1 }
  0xe7   :  { %v520_v21 = vadd.f32 %v1042_v19, %v962_v20  ;;  %v1064_v22 = vadd.f32 %v1063_v11, %v1062_v9  ;;  %v688_v11 = vsub.s32 5, %v1295_v29  ;;  %v685_v19 = vrot.slane %v664_v50, %v684_v7 }
  0xe8   :  { %v1044_v12 = vpop.f32.mrf.mxu0  ;;  %v1065_v13 = vpop.f32.mrf.mxu1 }
  0xe9   :  { %v560_v25 = vadd.f32 %v1064_v22, %v520_v21  ;;  %v919_v13 = vsub.s32 %v916_v4, %v1295_v29  ;;  %v689_v20 = vrot.slane %v664_v50, %v688_v11 }
  0xea   :  { %v1066_v14 = vpop.f32.mrf.mxu1 }
  0xec   :  { %v639_v15 = vpop.f32.mrf.mxu1 }
  0xee   :  { %v1098_v16 = vpop.f32.mrf.mxu1 }
  0xf0   :  { %v642_v17 = vpop.f32.mrf.mxu1 }
  0xf2   :  { %v1099_v18 = vpop.f32.mrf.mxu1 }
 0x102   :  { %v1084_v23 = vpop.f32.mrf.mxu0 }
 0x104   :  { %v1085_v24 = vpop.f32.mrf.mxu0 }
 0x105   :  { %v1086_v26 = vadd.f32 %v1085_v24, %v1084_v23 }
 0x106   :  { %v1087_v27 = vpop.f32.mrf.mxu0 }
 0x107   :  { %v600_v28 = vadd.f32 %v1086_v26, %v560_v25 }
 0x108   :  { %v1088_v30 = vpop.f32.mrf.mxu0 }
 0x109   :  { %v640_v31 = vadd.f32 %v639_v15, %v600_v28  ;;  %v693_v15 = vrot.slane %v664_v50, %v692_v5 }
 0x10b   :  { %v646_v32 = vmul.f32 0.5, %v640_v31  ;;  %904 = vst.msk [vmem:[%s1431_s6] sm:$0x3] %vm903_vm2, %v640_v31 }
 0x10d   :  { %v647_v33 = vmul.f32 1.442695, %v646_v32 }
 0x10f   :  { %1172 = vpow2.f32 %v647_v33 }
 0x11c   :  { %v1173_v37 = vpop.eup %1172 }
 0x11d   :  { %650 = vrot.lane.b32.xlu0 %v1173_v37, %s1178_s17 }
 0x18f   :  { %v651_v39 = vpop.permute.xlu0 %650 }
 0x190   :  { %v653_v40 = vmul.f32 %v651_v39, %v645_v38 }
 0x192   :  { %v654_v41 = vadd.f32 %v653_v40, %v640_v31 }
 0x194   :  { %v655_v43 = vpack.c.bf16 %v654_v41, %v654_v41 }
 0x196   :  { %1020 = vmatmul.mubr.msk.bf16.vlgmr.msra.gmra.mxu1 %vm481_vm1, %v655_v43  ;;  %1103 = vmatmul.mubr.msk.bf16.vlgmr.msra.gmra.mxu0 %vm481_vm1, %v655_v43 }
 0x197   :  { %796 = vmatpush1.bf16.msra.mxu1 %v1166_v42  ;;  %813 = vmatprep.mubr.bf16.mxu1 %v1177_v36 }
 0x198   :  { %836 = vmatprep.subr.bf16.mxu1 %v1171_v44 }
 0x19e   :  { %1021 = vmatmul.mubr.msk.bf16.vlgmr.msra.gmra.mxu1 %vm481_vm1, %v655_v43 }
 0x19f   :  { %837 = vmatpush1.bf16.msra.mxu1 %v1169_v45  ;;  %854 = vmatprep.mubr.bf16.mxu1 %v1177_v36 }
 0x1a6   :  { %1022 = vmatmul.mubr.msk.bf16.vlgmr.msra.gmra.mxu1 %vm481_vm1, %v655_v43 }
 0x256   :  { %v774_v47 = vpop.f32.mrf.mxu1  ;;  %v897_v48 = vpop.f32.mrf.mxu0 }
 0x257   :  { %v775_v3 = vadd.f32 %v774_v47, %v669_v58  ;;  %v898_v24 = vadd.f32 %v897_v48, %v693_v15 }
 0x258   :  { %v776_v51 = vpop.f32.mrf.mxu1  ;;  %v1104_v52 = vpop.f32.mrf.mxu0 }
 0x259   :  { %v777_v63 = vadd.f32 %v776_v51, %v673_v53  ;;  %v943_v30 = vrot.slane %v898_v24, %v919_v13 }
 0x25a   :  { %v778_v56 = vpop.f32.mrf.mxu1  ;;  %v900_v57 = vpop.f32.mrf.mxu0 }
 0x25b   :  { %v912_v8 = vcombine.low %v775_v3, %v777_v63 }
 0x25c   :  { %v779_v61 = vpop.f32.mrf.mxu1  ;;  %v1105_v62 = vpop.f32.mrf.mxu0 }
 0x25d   :  { %v920_v17 = vrot.slane %v912_v8, %v919_v13 }
 0x25e   :  { %v815_v2 = vpop.f32.mrf.mxu1 }
 0x25f   :  { %v816_v9 = vadd.f32 %v815_v2, %v677_v0 }
 0x260   :  { %v817_v6 = vpop.f32.mrf.mxu1 }
 0x261   :  { %v818_v10 = vadd.f32 %v817_v6, %v681_v1 }
 0x262   :  { %v819_v12 = vpop.f32.mrf.mxu1 }
 0x263   :  { %v913_v14 = vcombine.low %v816_v9, %v818_v10 }
 0x264   :  { %v820_v16 = vpop.f32.mrf.mxu1 }
 0x265   :  { %v927_v18 = vrot.slane %v913_v14, %v919_v13 }
 0x266   :  { %v856_v21 = vpop.f32.mrf.mxu1 }
 0x267   :  { %v928_v22 = vcombine.low %v920_v17, %v927_v18  ;;  %v857_v25 = vadd.f32 %v856_v21, %v685_v19 }
 0x268   :  { %v858_v23 = vpop.f32.mrf.mxu1 }
 0x269   :  { %947 = vst [vmem:[%s1434_s7] sm:$0xff] %v928_v22  ;;  %v859_v26 = vadd.f32 %v858_v23, %v689_v20 }
 0x26a   :  { %v860_v29 = vpop.f32.mrf.mxu1 }
 0x26b   :  { %v929_v27 = vcombine.low %v857_v25, %v859_v26 }
 0x26c   :  { %v861_v28 = vpop.f32.mrf.mxu1 }
 0x26d   :  { %v936_v31 = vrot.slane %v929_v27, %v919_v13 }
 0x26f   :  { %v944_v32 = vcombine.low %v936_v31, %v943_v30 }
 0x271   :  { %953 = vst.msk [vmem:[%s1434_s7 + $0x8] sm:$0x3f] %vm952_vm7, %v944_v32 }

// kernel: tile.12
= control target key start
LH: loop header
LB: loop body
LE: loop exit
PB: predicated region body
PF: predicated region fallthrough
CT: control target
= control target key end

     0   :  { %s22_s0 = inlined_call_operand.vmem [shape: f32[8], index: 0, kind: input, shape index: {}]   ;;  %s23_s1 = inlined_call_operand.vmem [shape: f32[4,8], index: 1, kind: output, shape index: {}]  }
   0x1   :  { %v4_v0 = vld [vmem:[%s22_s0] ss:$0 sm:$0xff] }
   0x2   :  { %5 = vst [vmem:[%s23_s1] sm:$0xf] %v4_v0 }

// kernel: tile.0
= control target key start
LH: loop header
LB: loop body
LE: loop exit
PB: predicated region body
PF: predicated region fallthrough
CT: control target
= control target key end

     0   :  { %s67_s8 = smov 125   ;;  %vm8_vm0 = vcmask 7168   ;;  %s68_s11 = smov 126   ;;  %s118_s0 = inlined_call_operand.vmem [shape: f32[4,8], index: 0, kind: input, shape index: {}]   ;;  %s119_s1 = inlined_call_operand.vmem [shape: f32[32,1], index: 1, kind: output, shape index: {}]  }
   0x1   :  { %v5_v0 = vld [vmem:[%s118_s0] sm:$0xf]  ;;  %s66_s0 = smov 127   ;;  %s69_s12 = smov 124  }
   0x2   :  { %6 = vst [vmem:[#allocation0] sm:$0xf] %v5_v0  ;;  %s70_s13 = smov 123   ;;  %s71_s14 = smov 122  }
   0x3   :  { %s72_s15 = smov 121  }
   0x9   :  { %v10_v1 = vld [vmem:[#allocation0] sm:$0xf]  }
   0xa   :  { %v22_v2 = vld [vmem:[#allocation0] sm:$0xf]   ;;  %11 = vrot.lane.b32.xlu0 %v10_v1, %s66_s0 }
   0xb   :  { %23 = vrot.lane.b32.xlu1 %v22_v2, %s67_s8  ;;  %v16_v3 = vld [vmem:[#allocation0] sm:$0xf]  }
   0xc   :  { %v28_v4 = vld [vmem:[#allocation0] sm:$0xf]  }
   0xd   :  { %v7_v5 = vld [vmem:[#allocation0] sm:$0xf]  }
   0xe   :  { %9 = vst.msk [vmem:[%s119_s1] ss:$8 sm:$0xf] %vm8_vm0, %v7_v5   ;;  %17 = vrot.lane.b32.xlu0 %v16_v3, %s68_s11  ;;  %v34_v6 = vld [vmem:[#allocation0] sm:$0xf]  }
   0xf   :  { %29 = vrot.lane.b32.xlu1 %v28_v4, %s69_s12  ;;  %v40_v7 = vld [vmem:[#allocation0] sm:$0xf]  }
  0x10   :  { %v46_v8 = vld [vmem:[#allocation0] sm:$0xf]  }
  0x12   :  { %35 = vrot.lane.b32.xlu0 %v34_v6, %s70_s13 }
  0x13   :  { %41 = vrot.lane.b32.xlu1 %v40_v7, %s71_s14 }
  0x16   :  { %47 = vrot.lane.b32.xlu0 %v46_v8, %s72_s15 }
  0x7c   :  { %v12_v9 = vpop.permute.xlu0 %11  }
  0x7d   :  { %v24_v10 = vpop.permute.xlu1 %23   ;;  %52 = vst.msk [vmem:[%s119_s1 + $0x1] ss:$8 sm:$0xf] %vm8_vm0, %v12_v9  }
  0x7e   :  { %54 = vst.msk [vmem:[%s119_s1 + $0x3] ss:$8 sm:$0xf] %vm8_vm0, %v24_v10  }
  0x80   :  { %v18_v11 = vpop.permute.xlu0 %17  }
  0x81   :  { %v30_v12 = vpop.permute.xlu1 %29   ;;  %53 = vst.msk [vmem:[%s119_s1 + $0x2] ss:$8 sm:$0xf] %vm8_vm0, %v18_v11  }
  0x82   :  { %55 = vst.msk [vmem:[%s119_s1 + $0x4] ss:$8 sm:$0xf] %vm8_vm0, %v30_v12  }
  0x84   :  { %v36_v13 = vpop.permute.xlu0 %35  }
  0x85   :  { %v42_v14 = vpop.permute.xlu1 %41   ;;  %56 = vst.msk [vmem:[%s119_s1 + $0x5] ss:$8 sm:$0xf] %vm8_vm0, %v36_v13  }
  0x86   :  { %57 = vst.msk [vmem:[%s119_s1 + $0x6] ss:$8 sm:$0xf] %vm8_vm0, %v42_v14  }
  0x88   :  { %v48_v15 = vpop.permute.xlu0 %47  }
  0x89   :  { %58 = vst.msk [vmem:[%s119_s1 + $0x7] ss:$8 sm:$0xf] %vm8_vm0, %v48_v15  }

// kernel: vae_forward.8
= control target key start
LH: loop header
LB: loop body
LE: loop exit
PB: predicated region body
PF: predicated region fallthrough
CT: control target
= control target key end

     0   :  { %v252_v0 = vmov 0   ;;  %vm133_vm0 = vcmask 130048   ;;  %s336_s1 = inlined_call_operand.vmem [shape: bf16[144,128], index: 1, kind: input, shape index: {}]   ;;  %s337_s0 = inlined_call_operand.vmem [shape: bf16[32,144], index: 0, kind: input, shape index: {}]   ;;  %s338_s2 = inlined_call_operand.vmem [shape: f32[32,1], index: 2, kind: input, shape index: {}]   ;;  %s339_s3 = inlined_call_operand.vmem [shape: f32[32,128], index: 3, kind: output, shape index: {}]  }
   0x1   :  { %140 = vmatprep.subr.bf16.mxu0 %v252_v0  ;;  %216 = vmatprep.subr.bf16.mxu1 %v252_v0  ;;  %v237_v1 = vld [vmem:[%s336_s1 + $0x38] sm:$0xff]   ;;  %v238_v2 = vld [vmem:[%s336_s1 + $0x30] sm:$0xff]   ;;  %v239_v3 = vld [vmem:[%s336_s1 + $0x28] sm:$0xff]  }
   0x2   :  { %236 = vset.pattern.permute.xlu1 %v252_v0  ;;  %235 = vset.pattern.permute.xlu0 %v252_v0  ;;  %v240_v4 = vld [vmem:[%s336_s1 + $0x20] sm:$0xff]   ;;  %v251_v6 = vld [vmem:[%s337_s0 + $0x14] ss:$8 sps:$4 sm:$0xff]   ;;  %v38_v11 = vld [vmem:[%s338_s2 + $0x8] sm:$0xff] }
   0x3   :  { %141 = vmatpush1.bf16.msra.mxu0 %v237_v1  ;;  %225 = vmatpush1.bf16.msra.mxu1 %v237_v1  ;;  %v248_v5 = vld [vmem:[%s337_s0 + $0x4] ss:$8 sps:$4 sm:$0xff]   ;;  %v39_v7 = vld [vmem:[%s338_s2 + $0x10] sm:$0xff]  ;;  %v40_v9 = vld [vmem:[%s338_s2 + $0x18] sm:$0xff] }
   0x4   :  { %142 = vmatprep.subr.bf16.mxu0 %v252_v0  ;;  %217 = vmatprep.subr.bf16.mxu1 %v252_v0  ;;  %v37_v8 = vld [vmem:[%s338_s2] sm:$0xff]  ;;  %v241_v10 = vld [vmem:[%s336_s1 + $0x18] sm:$0xff]   ;;  %v242_v12 = vld [vmem:[%s336_s1 + $0x10] sm:$0xff]  }
   0x5   :  { %214 = vmatprep.mubr.msk.bf16.mxu0 %vm133_vm0, %v248_v5  ;;  %53 = vperm.xlu1 %236, %v39_v7   ;;  %v243_v13 = vld [vmem:[%s336_s1 + $0x8] sm:$0xff]   ;;  %v244_v14 = vld [vmem:[%s336_s1] sm:$0xff]   ;;  %v249_v17 = vld [vmem:[%s337_s0 + $0x10] ss:$8 sps:$4 sm:$0xff]  }
   0x6   :  { %215 = vmatprep.mubr.msk.bf16.mxu1 %vm133_vm0, %v251_v6  ;;  %43 = vperm.xlu0 %235, %v37_v8   ;;  %v245_v15 = vld [vmem:[%s336_s1 + $0x40] sm:$0xff]  }
   0x7   :  { %143 = vmatpush1.bf16.msra.mxu0 %v238_v2  ;;  %226 = vmatpush1.bf16.msra.mxu1 %v238_v2  ;;  %v246_v16 = vld [vmem:[%s337_s0] ss:$8 sps:$4 sm:$0xff]  }
   0x8   :  { %144 = vmatprep.subr.bf16.mxu0 %v252_v0  ;;  %218 = vmatprep.subr.bf16.mxu1 %v252_v0 }
   0x9   :  { %58 = vperm.xlu1 %236, %v40_v9  }
   0xa   :  { %48 = vperm.xlu0 %235, %v38_v11  }
   0xb   :  { %145 = vmatpush1.bf16.msra.mxu0 %v239_v3  ;;  %227 = vmatpush1.bf16.msra.mxu1 %v239_v3 }
   0xc   :  { %146 = vmatprep.subr.bf16.mxu0 %v252_v0  ;;  %219 = vmatprep.subr.bf16.mxu1 %v252_v0 }
   0xf   :  { %147 = vmatpush1.bf16.msra.mxu0 %v240_v4  ;;  %228 = vmatpush1.bf16.msra.mxu1 %v240_v4 }
  0x10   :  { %148 = vmatprep.subr.bf16.mxu0 %v252_v0  ;;  %220 = vmatprep.subr.bf16.mxu1 %v252_v0 }
  0x13   :  { %149 = vmatpush1.bf16.msra.mxu0 %v241_v10  ;;  %229 = vmatpush1.bf16.msra.mxu1 %v241_v10 }
  0x14   :  { %150 = vmatprep.subr.bf16.mxu0 %v252_v0  ;;  %221 = vmatprep.subr.bf16.mxu1 %v252_v0 }
  0x17   :  { %151 = vmatpush1.bf16.msra.mxu0 %v242_v12  ;;  %230 = vmatpush1.bf16.msra.mxu1 %v242_v12 }
  0x18   :  { %152 = vmatprep.subr.bf16.mxu0 %v252_v0  ;;  %222 = vmatprep.subr.bf16.mxu1 %v252_v0 }
  0x1b   :  { %153 = vmatpush1.bf16.msra.mxu0 %v243_v13  ;;  %231 = vmatpush1.bf16.msra.mxu1 %v243_v13 }
  0x1c   :  { %154 = vmatprep.subr.bf16.mxu0 %v252_v0  ;;  %223 = vmatprep.subr.bf16.mxu1 %v252_v0 }
  0x1f   :  { %155 = vmatpush1.bf16.msra.mxu0 %v244_v14  ;;  %232 = vmatpush1.bf16.msra.mxu1 %v244_v14 }
  0x20   :  { %170 = vmatprep.subr.bf16.mxu0 %v252_v0  ;;  %224 = vmatprep.subr.bf16.mxu1 %v252_v0 }
  0x23   :  { %171 = vmatpush2.bf16.msra.mxu0 %v245_v15  ;;  %233 = vmatpush2.bf16.msra.mxu1 %v245_v15 }
  0x26   :  { %173 = vmatmul.mubr.bf16.vlgmr.msra.gmra.mxu0 %v246_v16  ;;  %181 = vmatmul.mubr.bf16.vlgmr.msra.gmra.mxu1 %v249_v17 }
  0x80   :  { %v54_v18 = vpop.permute.xlu1 %53 }
  0x81   :  { %v44_v19 = vpop.permute.xlu0 %43 }
  0x84   :  { %v59_v26 = vpop.permute.xlu1 %58 }
  0x85   :  { %v49_v27 = vpop.permute.xlu0 %48 }
  0xe6   :  { %v174_v20 = vpop.f32.mrf.mxu0  ;;  %v182_v21 = vpop.f32.mrf.mxu1 }
  0xe7   :  { %v175_v22 = vadd.f32 %v174_v20, %v44_v19  ;;  %v183_v23 = vadd.f32 %v182_v21, %v54_v18 }
  0xe8   :  { %v176_v24 = vpop.f32.mrf.mxu0  ;;  %v184_v25 = vpop.f32.mrf.mxu1 }
  0xe9   :  { %v189_v28 = vmax.f32 %v175_v22, 0.0  ;;  %v191_v29 = vmax.f32 %v183_v23, 0.0 }
  0xea   :  { %v177_v30 = vpop.f32.mrf.mxu0  ;;  %v185_v31 = vpop.f32.mrf.mxu1 }
  0xeb   :  { %193 = vst [vmem:[%s339_s3] sm:$0xff] %v189_v28  ;;  %195 = vst [vmem:[%s339_s3 + $0x10] sm:$0xff] %v191_v29  ;;  %v178_v32 = vadd.f32 %v177_v30, %v49_v27  ;;  %v186_v33 = vadd.f32 %v185_v31, %v59_v26 }
  0xec   :  { %v179_v34 = vpop.f32.mrf.mxu0  ;;  %v187_v35 = vpop.f32.mrf.mxu1 }
  0xed   :  { %v190_v36 = vmax.f32 %v178_v32, 0.0  ;;  %v192_v37 = vmax.f32 %v186_v33, 0.0 }
  0xef   :  { %194 = vst [vmem:[%s339_s3 + $0x8] sm:$0xff] %v190_v36  ;;  %196 = vst [vmem:[%s339_s3 + $0x18] sm:$0xff] %v192_v37 }

// kernel: tile.17
= control target key start
LH: loop header
LB: loop body
LE: loop exit
PB: predicated region body
PF: predicated region fallthrough
CT: control target
= control target key end

     0   :  { %s20_s0 = inlined_call_operand.<no memory space> [shape: f32[], index: 0, kind: input, shape index: {}]   ;;  %s21_s1 = inlined_call_operand.vmem [shape: f32[4,1], index: 1, kind: output, shape index: {}]  }
   0x1   :  { %v2_v0 = vstv %s20_s0 }
   0x2   :  { %3 = vst [vmem:[%s21_s1] sm:$0xf] %v2_v0 }

// kernel: vae_forward.9
= control target key start
LH: loop header
LB: loop body
LE: loop exit
PB: predicated region body
PF: predicated region fallthrough
CT: control target
= control target key end

     0   :  { %vm134_vm0 = vcmask 1043456   ;;  %v341_v2 = vmov 0   ;;  %vm130_vm1 = vcmask 588800   ;;  %s428_s1 = inlined_call_operand.vmem [shape: bf16[72,512], index: 1, kind: input, shape index: {}]   ;;  %s429_s2 = inlined_call_operand.vmem [shape: f32[4,1], index: 2, kind: input, shape index: {}]   ;;  %s430_s0 = inlined_call_operand.vmem [shape: bf16[4,72], index: 0, kind: input, shape index: {}]   ;;  %s431_s3 = inlined_call_operand.vmem [shape: f32[4,512], index: 3, kind: output, shape index: {}]  }
   0x1   :  { %v32_v0 = vld [vmem:[%s428_s1 + $0x80] sm:$0xff]  ;;  %v33_v1 = vld [vmem:[%s428_s1 + $0x88] sm:$0xff]  ;;  %179 = vmatprep.mubr.bf16.mxu0 %v341_v2  ;;  %220 = vmatprep.mubr.bf16.mxu1 %v341_v2 }
   0x2   :  { %v284_v3 = vcombine.high %v32_v0, %v32_v0  ;;  %v286_v4 = vcombine.high %v33_v1, %v33_v1  ;;  %v283_v5 = vcombine.low %v32_v0, %v32_v0  ;;  %v285_v6 = vcombine.low %v33_v1, %v33_v1  ;;  %v301_v7 = vld [vmem:[%s428_s1 + $0x64] ss:$16 sps:$4 sm:$0xff]   ;;  %296 = vset.pattern.permute.xlu0 %v341_v2  ;;  %v303_v8 = vld [vmem:[%s428_s1 + $0x6c] ss:$16 sps:$4 sm:$0xff]   ;;  %v305_v11 = vld [vmem:[%s428_s1 + $0x60] ss:$16 sps:$4 sm:$0xff]  }
   0x3   :  { %v306_v12 = vld [vmem:[%s428_s1 + $0x68] ss:$16 sps:$4 sm:$0xff]   ;;  %v307_v13 = vld [vmem:[%s428_s1 + $0x44] ss:$16 sps:$4 sm:$0xff]   ;;  %v309_v14 = vld [vmem:[%s428_s1 + $0x4c] ss:$16 sps:$4 sm:$0xff]  }
   0x4   :  { %287 = vmatprep.subr.msk.bf16.mxu0 %vm134_vm0, %v284_v3  ;;  %289 = vmatprep.subr.msk.bf16.mxu1 %vm134_vm0, %v286_v4  ;;  %v136_v9 = vsel %vm134_vm0, %v283_v5, 0  ;;  %v142_v10 = vsel %vm134_vm0, %v285_v6, 0  ;;  %v311_v15 = vld [vmem:[%s428_s1 + $0x40] ss:$16 sps:$4 sm:$0xff]   ;;  %v312_v16 = vld [vmem:[%s428_s1 + $0x48] ss:$16 sps:$4 sm:$0xff]  }
   0x5   :  { %154 = vmatpush1.bf16.msra.mxu0 %v136_v9  ;;  %195 = vmatpush1.bf16.msra.mxu1 %v142_v10  ;;  %v313_v17 = vld [vmem:[%s428_s1 + $0x24] ss:$16 sps:$4 sm:$0xff]   ;;  %v315_v18 = vld [vmem:[%s428_s1 + $0x2c] ss:$16 sps:$4 sm:$0xff]   ;;  %v34_v19 = vld [vmem:[%s429_s2] sm:$0xf] }
   0x6   :  { %155 = vmatprep.subr.bf16.mxu0 %v301_v7  ;;  %196 = vmatprep.subr.bf16.mxu1 %v303_v8  ;;  %v317_v20 = vld [vmem:[%s428_s1 + $0x20] ss:$16 sps:$4 sm:$0xff]   ;;  %v318_v21 = vld [vmem:[%s428_s1 + $0x28] ss:$16 sps:$4 sm:$0xff]   ;;  %v319_v22 = vld [vmem:[%s428_s1 + $0x4] ss:$16 sps:$4 sm:$0xff]  }
   0x7   :  { %v321_v23 = vld [vmem:[%s428_s1 + $0xc] ss:$16 sps:$4 sm:$0xff]   ;;  %37 = vperm.xlu0 %296, %v34_v19   ;;  %v323_v24 = vld [vmem:[%s428_s1] ss:$16 sps:$4 sm:$0xff]   ;;  %v324_v25 = vld [vmem:[%s428_s1 + $0x8] ss:$16 sps:$4 sm:$0xff]  }
   0x8   :  { %v15_v26 = vld [vmem:[%s430_s0] sm:$0x3] }
   0x9   :  { %156 = vmatpush1.bf16.msra.mxu0 %v305_v11  ;;  %197 = vmatpush1.bf16.msra.mxu1 %v306_v12 }
   0xa   :  { %157 = vmatprep.subr.bf16.mxu0 %v307_v13  ;;  %198 = vmatprep.subr.bf16.mxu1 %v309_v14 }
   0xd   :  { %158 = vmatpush1.bf16.msra.mxu0 %v311_v15  ;;  %199 = vmatpush1.bf16.msra.mxu1 %v312_v16 }
   0xe   :  { %159 = vmatprep.subr.bf16.mxu0 %v313_v17  ;;  %200 = vmatprep.subr.bf16.mxu1 %v315_v18 }
  0x11   :  { %160 = vmatpush1.bf16.msra.mxu0 %v317_v20  ;;  %201 = vmatpush1.bf16.msra.mxu1 %v318_v21 }
  0x12   :  { %161 = vmatprep.subr.bf16.mxu0 %v319_v22  ;;  %202 = vmatprep.subr.bf16.mxu1 %v321_v23 }
  0x15   :  { %162 = vmatpush1.bf16.msra.mxu0 %v323_v24  ;;  %203 = vmatpush1.bf16.msra.mxu1 %v324_v25 }
  0x18   :  { %288 = vmatmul.mubr.msk.bf16.vlgmr.msra.gmra.mxu0 %vm130_vm1, %v15_v26  ;;  %290 = vmatmul.mubr.msk.bf16.vlgmr.msra.gmra.mxu1 %vm130_vm1, %v15_v26 }
  0x82   :  { %v38_v27 = vpop.permute.xlu0 %37 }
  0xd8   :  { %v181_v28 = vpop.f32.mrf.mxu0  ;;  %v222_v29 = vpop.f32.mrf.mxu1 }
  0xd9   :  { %v182_v30 = vadd.f32 %v181_v28, %v38_v27  ;;  %v223_v31 = vadd.f32 %v222_v29, %v38_v27 }
  0xda   :  { %v183_v32 = vpop.f32.mrf.mxu0  ;;  %v224_v33 = vpop.f32.mrf.mxu1 }
  0xdb   :  { %v291_v34 = vmul.f32 -1.442695, %v182_v30  ;;  %v293_v35 = vmul.f32 -1.442695, %v223_v31  ;;  %v184_v36 = vadd.f32 %v183_v32, %v38_v27  ;;  %v225_v37 = vadd.f32 %v224_v33, %v38_v27 }
  0xdc   :  { %v185_v38 = vpop.f32.mrf.mxu0  ;;  %v226_v39 = vpop.f32.mrf.mxu1 }
  0xdd   :  { %325 = vpow2.f32 %v291_v34  ;;  %v292_v40 = vmul.f32 -1.442695, %v184_v36  ;;  %v294_v41 = vmul.f32 -1.442695, %v225_v37 }
  0xde   :  { %327 = vpow2.f32 %v293_v35  ;;  %v186_v42 = vpop.f32.mrf.mxu0  ;;  %v227_v43 = vpop.f32.mrf.mxu1 }
  0xdf   :  { %329 = vpow2.f32 %v292_v40 }
  0xe0   :  { %331 = vpow2.f32 %v294_v41 }
  0xea   :  { %v326_v44 = vpop.eup %325 }
  0xeb   :  { %v328_v45 = vpop.eup %327  ;;  %v241_v46 = vadd.f32 1.0, %v326_v44 }
  0xec   :  { %v330_v47 = vpop.eup %329  ;;  %v243_v48 = vadd.f32 1.0, %v328_v45 }
  0xed   :  { %v332_v49 = vpop.eup %331  ;;  %333 = vrcp.f32 %v241_v46  ;;  %v242_v50 = vadd.f32 1.0, %v330_v47 }
  0xee   :  { %335 = vrcp.f32 %v243_v48  ;;  %v244_v51 = vadd.f32 1.0, %v332_v49 }
  0xef   :  { %337 = vrcp.f32 %v242_v50 }
  0xf0   :  { %339 = vrcp.f32 %v244_v51 }
  0xfa   :  { %v334_v52 = vpop.eup %333 }
  0xfb   :  { %v336_v53 = vpop.eup %335 }
  0xfc   :  { %v338_v54 = vpop.eup %337 }
  0xfd   :  { %v340_v55 = vpop.eup %339  ;;  %v257_v56 = vcombine.low %v334_v52, %v338_v54 }
  0xfe   :  { %v258_v57 = vcombine.low %v336_v53, %v340_v55 }
  0xff   :  { %261 = vst [vmem:[%s431_s3] sm:$0xff] %v257_v56 }
 0x100   :  { %262 = vst [vmem:[%s431_s3 + $0x8] sm:$0xff] %v258_v57 }

</bundles_post_ra>
